<compile_context>
chip_gen: v7x
topology: tpu7x:2x2x1
jax: 0.10.0
libtpu: 0.0.40
codegen_flags: <defaults>
</compile_context>

<pallas_src>
import jax
import jax.numpy as jnp
from jax import lax
from jax.experimental import pallas as pl
from jax.experimental.pallas import tpu as pltpu


def _cam_kernel(x_ref, w_ref, bc_ref, wfc_ref, bfc_ref, out_ref):
    """One grid step = one batch image.

    x_ref   : (1, KKC, HW)  bf16   full 3x3 im2col, lane axis = HW
    w_ref   : (Cout, KKC)   bf16   conv weights, contraction over KKC
    bc_ref  : (Cout, 1)     f32    conv bias (lane-broadcast column)
    wfc_ref : (Cout, NCPAD) f32    fc weights^T with the 1/HW pool scale folded in
    bfc_ref : (1, NCPAD)    f32    fc bias, zero-padded to 128 lanes
    out_ref : (1, 1, NCPAD) f32    lane-dense logits slab
    """
    # Whole conv for this image in one MXU pass: (Cout, KKC) @ (KKC, HW).
    acc = jnp.dot(w_ref[...], x_ref[0], preferred_element_type=jnp.float32)
    feat = jnp.maximum(acc + bc_ref[...], 0.0)          # (Cout, HW), lane-dense
    # Global average pool = XLU lane reduction (the 1/HW scale lives in wfc).
    pooled = jnp.sum(feat, axis=1, keepdims=True)       # (Cout, 1)
    # Tiny fc on the VPU: (Cout,1) * (Cout,NCPAD), summed over sublanes.
    logits = jnp.sum(pooled * wfc_ref[...], axis=0, keepdims=True) + bfc_ref[...]
    out_ref[0] = logits.astype(out_ref.dtype)           # unmasked (1, 128) store


def cam_forward(x_nchw, w_conv, b_conv, w_fc, b_fc):
    """x_nchw: (N, Cin, H, W) float32. Returns logits (N, num_classes)."""
    N, Cin, H, W = x_nchw.shape
    Cout = w_conv.shape[0]
    NC = w_fc.shape[0]
    K = w_conv.shape[2]
    HW = H * W
    KKC = K * K * Cin
    NCPAD = 128                         # lane-dense logits slab; sliced to NC below

    # ---- wrapper glue: full 3x3 im2col, flattened KKC order = (kh, kw, cin) ----
    x_pad = jnp.pad(x_nchw, ((0, 0), (0, 0), (1, 1), (1, 1)))     # SAME padding
    taps = [x_pad[:, :, kh:kh + H, kw:kw + W]
            for kh in range(K) for kw in range(K)]                 # K*K x (N,Cin,H,W)
    x_im2col = (jnp.stack(taps, axis=1)                            # (N,K*K,Cin,H,W)
                .reshape(N, KKC, HW).astype(jnp.bfloat16))         # lane axis = HW

    # conv weight (Cout,Cin,Kh,Kw) -> (Cout, (kh,kw,cin)) to match x_im2col.
    w_flat = (jnp.transpose(w_conv, (0, 2, 3, 1))
              .reshape(Cout, KKC).astype(jnp.bfloat16))
    bc = b_conv.reshape(Cout, 1).astype(jnp.float32)

    # fc weights transposed, 1/HW pool scale folded in, zero-padded to 128 lanes.
    wfc = jnp.zeros((Cout, NCPAD), jnp.float32).at[:, :NC].set(
        jnp.transpose(w_fc, (1, 0)).astype(jnp.float32) / HW)
    bfc = jnp.zeros((1, NCPAD), jnp.float32).at[:, :NC].set(
        b_fc.astype(jnp.float32))

    grid_spec = pltpu.PrefetchScalarGridSpec(
        num_scalar_prefetch=0,
        grid=(N,),                                    # batch only; megacore on v7x
        in_specs=[
            pl.BlockSpec((1, KKC, HW), lambda n: (n, 0, 0)),
            pl.BlockSpec((Cout, KKC), lambda n: (0, 0)),
            pl.BlockSpec((Cout, 1), lambda n: (0, 0)),
            pl.BlockSpec((Cout, NCPAD), lambda n: (0, 0)),
            pl.BlockSpec((1, NCPAD), lambda n: (0, 0)),
        ],
        out_specs=pl.BlockSpec((1, 1, NCPAD), lambda n: (n, 0, 0)),
    )

    logits = pl.pallas_call(
        _cam_kernel,
        out_shape=jax.ShapeDtypeStruct((N, 1, NCPAD), jnp.float32),
        grid_spec=grid_spec,
        compiler_params=pltpu.CompilerParams(
            dimension_semantics=("parallel",)),
    )(x_im2col, w_flat, bc, wfc, bfc)
    return logits[:, 0, :NC]


def cam_reference(x_nchw, w_conv, b_conv, w_fc, b_fc):
    """Pure-JAX f32 reference matching the PyTorch forward semantics."""
    feat = lax.conv_general_dilated(
        x_nchw, w_conv, window_strides=(1, 1), padding="SAME",
        dimension_numbers=("NCHW", "OIHW", "NCHW"))
    feat = jnp.maximum(feat + b_conv[None, :, None, None], 0.0)
    pooled = jnp.mean(feat, axis=(2, 3))                           # (N, Cout)
    return pooled @ w_fc.T + b_fc[None, :]


if __name__ == "__main__":
    N, Cin, H, W = 2, 4, 16, 16
    Cout, NC, K = 32, 10, 3

    key = jax.random.PRNGKey(0)
    k_x, k_wc, k_bc, k_wf, k_bf = jax.random.split(key, 5)

    x = jax.random.normal(k_x, (N, Cin, H, W), dtype=jnp.float32)
    w_conv = jax.random.normal(k_wc, (Cout, Cin, K, K), dtype=jnp.float32) * 0.1
    b_conv = jax.random.normal(k_bc, (Cout,), dtype=jnp.float32) * 0.1
    w_fc = jax.random.normal(k_wf, (NC, Cout), dtype=jnp.float32) * 0.1
    b_fc = jax.random.normal(k_bf, (NC,), dtype=jnp.float32) * 0.1

    out = cam_forward(x, w_conv, b_conv, w_fc, b_fc)
    out = jax.block_until_ready(out)

    ref = cam_reference(x, w_conv, b_conv, w_fc, b_fc)
    assert out.shape == (N, NC)
    # bf16 conv inputs -> relaxed tolerance vs. the f32 reference.
    assert jnp.allclose(out, ref, atol=2e-2, rtol=2e-2), \
        f"max abs err {jnp.max(jnp.abs(out - ref))}"

    print("KERNEL_OK")
</pallas_src>

<mosaic_0001>
module attributes {stable_mosaic.version = 11 : i64} {
  func.func @_cam_kernel(%arg0: i32, %arg1: memref<1x36x256xbf16, #tpu.memory_space<vmem>>, %arg2: memref<32x36xbf16, #tpu.memory_space<vmem>>, %arg3: memref<32x1xf32, #tpu.memory_space<vmem>>, %arg4: memref<32x128xf32, #tpu.memory_space<vmem>>, %arg5: memref<1x128xf32, #tpu.memory_space<vmem>>, %arg6: memref<1x1x128xf32, #tpu.memory_space<vmem>>) attributes {dimension_semantics = [#tpu.dimension_semantics<parallel>], iteration_bounds = array<i64: 2>, scalar_prefetch = 0 : i64, scratch_operands = 0 : i64, tpu.core_type = #tpu.core_type<tc>, window_params = [{transform_indices = @transform_0, window_bounds = array<i64: 1, 36, 256>}, {pipeline_mode = #tpu.pipeline_mode<synchronous>, transform_indices = @transform_1, window_bounds = array<i64: 32, 36>}, {pipeline_mode = #tpu.pipeline_mode<synchronous>, transform_indices = @transform_2, window_bounds = array<i64: 32, 1>}, {pipeline_mode = #tpu.pipeline_mode<synchronous>, transform_indices = @transform_3, window_bounds = array<i64: 32, 128>}, {pipeline_mode = #tpu.pipeline_mode<synchronous>, transform_indices = @transform_4, window_bounds = array<i64: 1, 128>}, {transform_indices = @transform_5, window_bounds = array<i64: 1, 1, 128>}]} {
    %c0 = arith.constant 0 : index
    %c0_0 = arith.constant 0 : index
    %0 = vector.load %arg2[%c0, %c0_0] : memref<32x36xbf16, #tpu.memory_space<vmem>>, vector<32x36xbf16>
    %c0_1 = arith.constant 0 : index
    %c0_2 = arith.constant 0 : index
    %c0_3 = arith.constant 0 : index
    %1 = vector.load %arg1[%c0_1, %c0_2, %c0_3] : memref<1x36x256xbf16, #tpu.memory_space<vmem>>, vector<1x36x256xbf16>
    %2 = vector.shape_cast %1 : vector<1x36x256xbf16> to vector<36x256xbf16>
    %cst = arith.constant dense<0.000000e+00> : vector<32x256xf32>
    %3 = tpu.matmul %0, %2, %cst {dimension_numbers = #tpu.dot_dimension_numbers<[1], [0], [0], [1], [0, 0, 1, 1], [], []>} : vector<32x36xbf16>, vector<36x256xbf16>, vector<32x256xf32> -> vector<32x256xf32>
    %c0_4 = arith.constant 0 : index
    %c0_5 = arith.constant 0 : index
    %4 = vector.load %arg3[%c0_4, %c0_5] : memref<32x1xf32, #tpu.memory_space<vmem>>, vector<32x1xf32>
    %5 = vector.broadcast %4 : vector<32x1xf32> to vector<32x256xf32>
    %6 = arith.addf %3, %5 : vector<32x256xf32>
    %cst_6 = arith.constant 0.000000e+00 : f32
    %7 = vector.broadcast %cst_6 : f32 to vector<32x256xf32>
    %8 = arith.maximumf %6, %7 : vector<32x256xf32>
    %cst_7 = arith.constant dense<0.000000e+00> : vector<32xf32>
    %9 = vector.multi_reduction <add>, %8, %cst_7 [1] : vector<32x256xf32> to vector<32xf32>
    %10 = vector.shape_cast %9 : vector<32xf32> to vector<32x1xf32>
    %c0_8 = arith.constant 0 : index
    %c0_9 = arith.constant 0 : index
    %11 = vector.load %arg4[%c0_8, %c0_9] : memref<32x128xf32, #tpu.memory_space<vmem>>, vector<32x128xf32>
    %12 = vector.broadcast %10 : vector<32x1xf32> to vector<32x128xf32>
    %13 = arith.mulf %12, %11 : vector<32x128xf32>
    %cst_10 = arith.constant dense<0.000000e+00> : vector<128xf32>
    %14 = vector.multi_reduction <add>, %13, %cst_10 [0] : vector<32x128xf32> to vector<128xf32>
    %15 = vector.shape_cast %14 : vector<128xf32> to vector<1x128xf32>
    %c0_11 = arith.constant 0 : index
    %c0_12 = arith.constant 0 : index
    %16 = vector.load %arg5[%c0_11, %c0_12] : memref<1x128xf32, #tpu.memory_space<vmem>>, vector<1x128xf32>
    %17 = arith.addf %15, %16 : vector<1x128xf32>
    %c0_13 = arith.constant 0 : index
    %c0_14 = arith.constant 0 : index
    %c0_15 = arith.constant 0 : index
    %18 = vector.load %arg6[%c0_13, %c0_14, %c0_15] : memref<1x1x128xf32, #tpu.memory_space<vmem>>, vector<1x1x128xf32>
    %19 = vector.shape_cast %18 : vector<1x1x128xf32> to vector<1x128xf32>
    %20 = vector.shape_cast %17 : vector<1x128xf32> to vector<1x1x128xf32>
    tpu.vector_store %arg6[%c0_13, %c0_14, %c0_15], %20 {strides = array<i32>} : memref<1x1x128xf32, #tpu.memory_space<vmem>>, vector<1x1x128xf32>,
    return
  }
  func.func @transform_0(%arg0: i32) -> (i32, i32, i32) {
    %c0_i32 = arith.constant 0 : i32
    %c0_i32_0 = arith.constant 0 : i32
    %c0_i32_1 = arith.constant 0 : i32
    return %arg0, %c0_i32, %c0_i32_0 : i32, i32, i32
  }
  func.func @transform_1(%arg0: i32) -> (i32, i32) {
    %c0_i32 = arith.constant 0 : i32
    %c0_i32_0 = arith.constant 0 : i32
    %c0_i32_1 = arith.constant 0 : i32
    return %c0_i32, %c0_i32_0 : i32, i32
  }
  func.func @transform_2(%arg0: i32) -> (i32, i32) {
    %c0_i32 = arith.constant 0 : i32
    %c0_i32_0 = arith.constant 0 : i32
    %c0_i32_1 = arith.constant 0 : i32
    return %c0_i32, %c0_i32_0 : i32, i32
  }
  func.func @transform_3(%arg0: i32) -> (i32, i32) {
    %c0_i32 = arith.constant 0 : i32
    %c0_i32_0 = arith.constant 0 : i32
    %c0_i32_1 = arith.constant 0 : i32
    return %c0_i32, %c0_i32_0 : i32, i32
  }
  func.func @transform_4(%arg0: i32) -> (i32, i32) {
    %c0_i32 = arith.constant 0 : i32
    %c0_i32_0 = arith.constant 0 : i32
    %c0_i32_1 = arith.constant 0 : i32
    return %c0_i32, %c0_i32_0 : i32, i32
  }
  func.func @transform_5(%arg0: i32) -> (i32, i32, i32) {
    %c0_i32 = arith.constant 0 : i32
    %c0_i32_0 = arith.constant 0 : i32
    %c0_i32_1 = arith.constant 0 : i32
    return %arg0, %c0_i32, %c0_i32_0 : i32, i32, i32
  }
}

</mosaic_0001>

<bundles_post_ra>
// kernel: tpu_custom_call.1
= control target key start
LH: loop header
LB: loop body
LE: loop exit
PB: predicated region body
PF: predicated region fallthrough
CT: control target
= control target key end

     0   :  { %10 = vsyncpa [#allocation3], 0  ;;  %s773_s0 = inlined_call_operand.vmem [shape: bf16[2,36,256], index: 0, kind: input, shape index: {}]   ;;  %s774_s1 = inlined_call_operand.vmem [shape: bf16[32,36], index: 1, kind: input, shape index: {}]   ;;  %s775_s2 = inlined_call_operand.vmem [shape: f32[32,1], index: 2, kind: input, shape index: {}]   ;;  %s776_s3 = inlined_call_operand.vmem [shape: f32[32,128], index: 3, kind: input, shape index: {}]   ;;  %s777_s4 = inlined_call_operand.vmem [shape: f32[1,128], index: 4, kind: input, shape index: {}]   ;;  %s778_s5 = inlined_call_operand.hbm [shape: f32[2,1,128], index: 5, kind: output, shape index: {}]  }
   0x1   :  { %12 = vsyncpa [#allocation3 + $0x1], 0  ;;  %s640_s18 = smov 0   ;;  %s642_s19 = smov 0  }
   0x2   :  { %s644_s20 = smov 0   ;;  %s646_s21 = smov 0  }
   0x3 LB: > { %s661_s22 = sadd.s32 4294967295, %s606_s21   ;;  %s466_s23 = sadd.s32 4294967294, %s606_s21   ;;  %s606_s21 = sphi %s646_s21, %s784_s21   ;;  %s602_s20 = sphi %s644_s20, %s783_s20   ;;  %s598_s19 = sphi %s642_s19, %s782_s19   ;;  %s594_s18 = sphi %s640_s18, %s781_s18  }
   0x4   : > { %s665_s24 = sadd.s32 1, %s606_s21   ;;  %s135_s25 = sadd.s32 1, %s602_s20 }
   0x5   : > { %s132_s26 = ssub.s32 %s606_s21, %s665_s24  ;;  %p145_p0 = scmp.ne.s32.totalorder %s602_s20, %s598_s19 }
   0x6   : > { %p133_p1 = scmp.eq.s32.totalorder %s132_s26, 0  ;;  %p146_p2 = scmp.eq.s32.totalorder %s661_s22, 1 }
   0x7   : > { %p151_p3 = scmp.ne.s32.totalorder %s598_s19, %s594_s18  ;;  %p152_p4 = scmp.eq.s32.totalorder %s466_s23, 1 }
   0x8   : > { %s676_s27 = scalar_select %p133_p1, %s602_s20, %s135_s25  }
   0x9   : > { %p678_p5 = por %p146_p2, %p145_p0  ;;  %p682_p6 = por %p152_p4, %p151_p3 }
   0xa   : > { %p469_p7 = scmp.ge.s32.totalorder %s606_s21, 1  ;;  %p190_p8 = scmp.lt.s32.totalorder %s606_s21, 3 }
   0xc   : > { %p191_p9 = pnand %p469_p7, %p190_p8 }
   0xd   : > { %p217_p10 = scmp.lt.s32.totalorder (!%p191_p9), %s661_s22, 1  ;;  %v608_v0 = vmov (!%p191_p9), 0   ;;  %v232_v1 = vld [vmem:[%s775_s2] sm:$0xff] (!%p191_p9)  ;;  %v234_v2 = vld [vmem:[%s775_s2 + $0x10] sm:$0xff] (!%p191_p9)  ;;  %v233_v3 = vld [vmem:[%s775_s2 + $0x8] sm:$0xff] (!%p191_p9)  ;;  %vm298_vm0 = vcmask (!%p191_p9), 1041408  }
   0xe   : > { %194 = sbr.rel (%p191_p9) target bundleno = 440 (0x1b8), region = 40  ;;  %337 = vmatprep.mubr.bf16.mxu0 (!%p191_p9), %v608_v0  ;;  %347 = vmatprep.mubr.bf16.mxu1 (!%p191_p9), %v608_v0  ;;  %v235_v4 = vld [vmem:[%s775_s2 + $0x18] sm:$0xff] (!%p191_p9)  ;;  %v542_v13 = vld [vmem:[%s774_s1] sm:$0xff] (!%p191_p9)   ;;  %v543_v14 = vld [vmem:[%s774_s1 + $0x8] sm:$0xff] (!%p191_p9)   ;;  %vm291_vm1 = vcmask (!%p191_p9), 293888   ;;  %s215_s14 = sand.u32 (!%p191_p9), 1, %s598_s19  }
   0xf   : > { %532 = vset.pattern.permute.xlu0 (!%p191_p9), %v608_v0  ;;  %533 = vset.pattern.permute.xlu1 (!%p191_p9), %v608_v0  ;;  %v378_v47 = vld [vmem:[%s776_s3] sm:$0xff] (!%p191_p9)  ;;  %v379_v49 = vld [vmem:[%s776_s3 + $0x8] sm:$0xff] (!%p191_p9)  ;;  %v380_v51 = vld [vmem:[%s776_s3 + $0x10] sm:$0xff] (!%p191_p9)  ;;  %s216_s23 = scalar_lea.vmem (!%p191_p9), [#allocation2], %s215_s14  ;;  %s399_s7 = scalar_lea.sflag (!%p191_p9), [#allocation3], %s215_s14 }
  0x10   : > { %238 = vperm.xlu0 (!%p191_p9), %532, %v232_v1   ;;  %248 = vperm.xlu1 (!%p191_p9), %533, %v234_v2   ;;  %v381_v57 = vld [vmem:[%s776_s3 + $0x18] sm:$0xff] (!%p191_p9)  ;;  %s411_s25 = sshll.u32 (!%p191_p9), %s216_s23, 4  ;;  %s733_s25 = int_to_ptr.vmem [resolvable:$true] %s411_s25 }
  0x11   : > { %s544_s8 = scalar_lea.vmem (!%p191_p9), %s733_s25, 16 }
  0x12   : > { %p545_p11 = scmp.ne.s32.totalorder (!%p191_p9), %s733_s25, %s544_s8 }
  0x14   : > { %243 = vperm.xlu0 (!%p191_p9), %532, %v233_v3   ;;  %253 = vperm.xlu1 (!%p191_p9), %533, %v235_v4   ;;  %v395_v3 = vld [vmem:[%s777_s4] sm:$0x1] (!%p191_p9)  ;;  %p546_p12 = pnand (!%p191_p9), %p545_p11, %p678_p5 }
  0x15   : > { %s218_s30 = scalar_select %p217_p10, %s661_s22, 1 }
  0x16   : > { %p547_p13 = pneg %p546_p12 }
  0x17   : > { %s491_s10 = smul.u32 40, %s218_s30 }
  0x19   : > { %s221_s17 = scalar_lea.vmem %s773_s0, %s491_s10 }
  0x1a   : > { %v534_v5 = vld [vmem:[%s221_s17 + $0x4] ss:$8 sps:$4 sm:$0xff]   ;;  %v536_v6 = vld [vmem:[%s221_s17] ss:$8 sps:$4 sm:$0xff]   ;;  %v537_v7 = vld [vmem:[%s221_s17 + $0x14] ss:$8 sps:$4 sm:$0xff]  }
  0x1b   : > { %305 = vmatprep.subr.bf16.mxu0 %v534_v5  ;;  %485 = vmatprep.subr.bf16.mxu1 %v534_v5  ;;  %v231_v8 = vld [vmem:[%s221_s17 + $0x20] sm:$0x33]  ;;  %v539_v9 = vld [vmem:[%s221_s17 + $0x10] ss:$8 sps:$4 sm:$0xff]   ;;  %s482_s17 = sshll.u32 %s661_s22, 4  ;;  %s609_s22 = smov [#allocation2]  }
  0x1c   : > { %306 = vmatpush1.bf16.msra.mxu0 %v536_v6  ;;  %488 = vmatpush1.bf16.msra.mxu1 %v536_v6  ;;  %v478_v10 = vcombine.high %v231_v8, %v231_v8  ;;  %v477_v11 = vcombine.low %v231_v8, %v231_v8  ;;  %s731_s6 = scalar_lea.hbm %s778_s5, %s482_s17  ;;  %s548_s9 = sshll.u32 %s609_s22, 4  ;;  %s549_s9 = int_to_ptr.vmem [resolvable:$false] %s548_s9 }
  0x1d   : > { %307 = vmatprep.subr.bf16.mxu0 %v537_v7  ;;  %486 = vmatprep.subr.bf16.mxu1 %v537_v7  ;;  %s550_s10 = scalar_lea.vmem %s549_s9, 32  ;;  %p551_p0 = scmp.lt.s32.totalorder %s733_s25, %s549_s9 }
  0x1e   : > { %v300_v12 = vsel %vm298_vm0, %v477_v11, 0  ;;  %p552_p1 = scmp.lt.s32.totalorder %s550_s10, %s544_s8 }
  0x20   : > { %308 = vmatpush1.bf16.msra.mxu0 %v539_v9  ;;  %489 = vmatpush1.bf16.msra.mxu1 %v539_v9  ;;  %p553_p2 = por %p552_p1, %p551_p0 }
  0x21   : > { %479 = vmatprep.subr.msk.bf16.mxu0 %vm298_vm0, %v478_v10  ;;  %487 = vmatprep.subr.msk.bf16.mxu1 %vm298_vm0, %v478_v10 }
  0x22   : > { %p554_p3 = pnand %p553_p2, %p547_p13 }
  0x24   : > { %310 = vmatpush1.bf16.msra.mxu0 %v300_v12  ;;  %490 = vmatpush1.bf16.msra.mxu1 %v300_v12 }
  0x27   : > { %480 = vmatmul.mubr.msk.bf16.vlgmr.msra.gmra.mrb[0].mxu0 %vm291_vm1, %v542_v13  ;;  %481 = vmatmul.mubr.msk.bf16.vlgmr.msra.gmra.mrb[0].mxu1 %vm291_vm1, %v543_v14 }
  0x8f   : > { %v239_v15 = vpop.permute.xlu0 %238  ;;  %v249_v16 = vpop.permute.xlu1 %248 }
  0x93   : > { %v244_v17 = vpop.permute.xlu0 %243  ;;  %v254_v18 = vpop.permute.xlu1 %253 }
  0xfa   : > { %v339_v19 = vpop.f32.mrb[0].mxu0  ;;  %v349_v20 = vpop.f32.mrb[0].mxu1 }
  0xfb   : > { %v340_v21 = vadd.f32 %v339_v19, %v239_v15  ;;  %v341_v22 = vpop.f32.mrb[1].mxu0  ;;  %v350_v23 = vadd.f32 %v349_v20, %v249_v16  ;;  %v351_v24 = vpop.f32.mrb[1].mxu1 }
  0xfc   : > { %v342_v25 = vadd.f32 %v341_v22, %v239_v15  ;;  %v343_v26 = vpop.f32.mrb[2].mxu0  ;;  %v352_v27 = vadd.f32 %v351_v24, %v249_v16  ;;  %v353_v28 = vpop.f32.mrb[2].mxu1 }
  0xfd   : > { %v358_v29 = vmax.f32 %v340_v21, 0.0  ;;  %v362_v30 = vmax.f32 %v350_v23, 0.0  ;;  %v344_v31 = vadd.f32 %v343_v26, %v244_v17  ;;  %v345_v32 = vpop.f32.mrb[3].mxu0  ;;  %v354_v33 = vadd.f32 %v353_v28, %v254_v18  ;;  %v355_v34 = vpop.f32.mrb[3].mxu1 }
  0xfe   : > { %v359_v35 = vmax.f32 %v342_v25, 0.0  ;;  %v363_v36 = vmax.f32 %v352_v27, 0.0  ;;  %v346_v37 = vadd.f32 %v345_v32, %v244_v17  ;;  %v356_v38 = vadd.f32 %v355_v34, %v254_v18 }
  0xff   : > { %v360_v39 = vmax.f32 %v344_v31, 0.0  ;;  %v364_v40 = vmax.f32 %v354_v33, 0.0 }
 0x100   : > { %v361_v41 = vmax.f32 %v346_v37, 0.0  ;;  %v365_v42 = vmax.f32 %v356_v38, 0.0  ;;  %v366_v43 = vadd.f32 %v359_v35, %v358_v29  ;;  %v372_v44 = vadd.f32 %v363_v36, %v362_v30 }
 0x102   : > { %367 = vadd.xlane.f32.xlu0 %v366_v43  ;;  %v369_v45 = vadd.f32 %v361_v41, %v360_v39  ;;  %v375_v46 = vadd.f32 %v365_v42, %v364_v40 }
 0x104   : > { %370 = vadd.xlane.f32.xlu1 %v369_v45 }
 0x106   : > { %373 = vadd.xlane.f32.xlu0 %v372_v44 }
 0x10a   : > { %376 = vadd.xlane.f32.xlu0 %v375_v46 }
 0x18f   : > { %v368_v48 = vpop.xlane.xlu0 %367 }
 0x190   : > { %v382_v52 = vmul.f32 %v378_v47, %v368_v48 }
 0x191   : > { %v371_v50 = vpop.xlane.xlu1 %370 }
 0x192   : > { %v383_v53 = vmul.f32 %v379_v49, %v371_v50 }
 0x193   : > { %v374_v54 = vpop.xlane.xlu0 %373 }
 0x194   : > { %v386_v55 = vadd.f32 %v383_v53, %v382_v52  ;;  %v384_v56 = vmul.f32 %v380_v51, %v374_v54 }
 0x196   : > { %v387_v59 = vadd.f32 %v386_v55, %v384_v56 }
 0x197   : > { %v377_v58 = vpop.xlane.xlu0 %376 }
 0x198   : > { %v385_v60 = vmul.f32 %v381_v57, %v377_v58 }
 0x19a   : > { %v388_v61 = vadd.f32 %v387_v59, %v385_v60 }
 0x19c   : > { %v389_v62 = vrot.slane %v388_v61, 4 }
 0x19e   : > { %v390_v63 = vadd.f32 %v389_v62, %v388_v61 }
 0x1a0   : > { %v391_v0 = vrot.slane %v390_v63, 2 }
 0x1a2   : > { %v392_v1 = vadd.f32 %v391_v0, %v390_v63 }
 0x1a4   : > { %v393_v2 = vrot.slane %v392_v1, 1 }
 0x1a6   : > { %v394_v4 = vadd.f32 %v393_v2, %v392_v1 }
 0x1a8   : > { %v396_v5 = vadd.f32 %v395_v3, %v394_v4 }
 0x1aa   : > { %397 = vst [vmem:[%s216_s23] sm:$0x1] %v396_v5 }
 0x1ab   : > { %557 = shalt.err (!%p554_p3)
}
 0x1ac   : > { %s558_s11 = scalar_lea.hbm %s731_s6, 16  ;;  %s562_s14 = scalar_lea.hbm %s778_s5, 32 }
 0x1ad   : > { %p559_p4 = scmp.ne.s32.totalorder %s731_s6, %s558_s11  ;;  %p563_p9 = scmp.lt.u32.totalorder %s731_s6, %s778_s5 }
 0x1ae   : > { %p564_p10 = scmp.lt.u32.totalorder %s562_s14, %s558_s11  ;;  %p566_p12 = scmp.lt.u32.totalorder %s558_s11, %s731_s6 }
 0x1af   : > { %p560_p7 = pnand %p559_p4, %p678_p5 }
 0x1b0   : > { %p565_p11 = por %p564_p10, %p563_p9 }
 0x1b1   : > { %p561_p8 = pneg %p560_p7 }
 0x1b2   : > { %p567_p13 = por %p566_p12, %p565_p11 }
 0x1b4   : > { %p568_p0 = pnand %p567_p13, %p561_p8 }
 0x1b6   : > { %571 = shalt.err (!%p568_p0)
}
 0x1b7   : > { %492 = dma.vmem_to_hbm [thread:$0]  (%p678_p5), %s733_s25, 16, %s731_s6, %s399_s7  }
 0x1b8 PF: > { %p498_p1 = scmp.ge.s32.totalorder %s606_s21, 2  ;;  %s423_s17 = sand.u32 1, %s594_s18  }
 0x1b9   : > { %s424_s23 = scalar_lea.sflag [#allocation3], %s423_s17 }
 0x1ba   : > { %p495_p2 = pnand %p498_p1, %p682_p6 }
 0x1bc   : > { %589 = dma.done.wait (!%p495_p2), %s424_s23, 16  }
 0x1bd   : > { %591 = vsyncadd (!%p495_p2), %s424_s23, 4294967280  ;;  %p15_p3 = scmp.ge.s32.totalorder %s665_s24, 4   ;;  %s781_s18 = smov %s598_s19 }
 0x1be   : > { %s782_s19 = smov %s602_s20  ;;  %s783_s20 = smov %s676_s27 }
 0x1bf   : > { %s784_s21 = smov %s665_s24  ;;  %17 = sbr.rel (!%p15_p3) target bundleno = 3 (0x3), region = 75 }
 0x1c6   :  { %428 = vsyncpa [#allocation3], 1 }
 0x1c7   :  { %430 = vsyncpa [#allocation3 + $0x1], 1 }

</bundles_post_ra>
